<compile_context>
chip_gen: v5e
topology: v5e:2x2
jax: 0.10.0
libtpu: 0.0.40
codegen_flags: <defaults>
</compile_context>

<pallas_src>
import jax
import jax.numpy as jnp
from jax.experimental import pallas as pl
from jax.experimental.pallas import tpu as pltpu

_NEG_BIG = -1e30  # bias for padded label lanes -> exp() underflows to exactly 0


def classifier_kernel(x_ref, w1_ref, b1_ref, w2_ref, b2_ref, w3_ref, b3_ref,
                      o_ref, h1_ref, h2_ref):
    # layer 1: cast x to bf16 in-kernel (VPU cast hides under the MXU),
    # bf16 matmul with f32 accumulation; bias + ReLU in f32; park as bf16.
    x_bf = x_ref[...].astype(jnp.bfloat16)
    a1 = jnp.dot(x_bf, w1_ref[...], preferred_element_type=jnp.float32)
    h1_ref[...] = jnp.maximum(a1 + b1_ref[...], 0.0).astype(h1_ref.dtype)

    # layer 2: bf16 matmul, f32 accumulate; bias + ReLU in f32; park as bf16.
    a2 = jnp.dot(h1_ref[...], w2_ref[...], preferred_element_type=jnp.float32)
    h2_ref[...] = jnp.maximum(a2 + b2_ref[...], 0.0).astype(h2_ref.dtype)

    # layer 3: linear -> softmax over the (lane-padded) label axis.
    logits = jnp.dot(h2_ref[...], w3_ref[...],
                     preferred_element_type=jnp.float32)
    logits = logits + b3_ref[...]                    # padded lanes: -1e30 bias
    m = jnp.max(logits, axis=-1, keepdims=True)
    e = jnp.exp(logits - m)                          # padded lanes -> 0
    denom = jnp.sum(e, axis=-1, keepdims=True)
    # EUP approx reciprocal + one Newton refinement -> near-exact row sums.
    r = pl.reciprocal(denom, approx=True)
    r = r * (2.0 - denom * r)
    o_ref[...] = (e * r).astype(o_ref.dtype)


def _round_up(x, m):
    return ((x + m - 1) // m) * m


def _pick_batch_tile(batch, requested_tile):
    """Adaptive batch tile.

    * never bigger than the (16-row rounded) batch -> no 8->128 padding waste
      for small-batch inference;
    * for larger batches, capped at ceil(B/2) rounded to 16 so the grid has
      >= 2 steps and the "parallel" axis can be sharded across both
      TensorCores on v7x (harmless extra step on v5e/v6e, ~0.35 us).
    """
    tile = min(requested_tile, _round_up(batch, 16))
    if batch > 16:
        tile = min(tile, _round_up((batch + 1) // 2, 16))
    return max(tile, 16)


def _vmem_limit_bytes(batch_tile, in_size, h1, h2, n_out, out_bytes):
    bf16, f32 = 2, 4
    x_tile = batch_tile * in_size * f32 * 2                # f32 in, double-buffered
    weights = (in_size * h1 + h1 * h2 + h2 * n_out) * bf16 * 2
    biases = (h1 + h2 + n_out) * f32 * 2
    out_tile = batch_tile * n_out * out_bytes * 2
    scratch = batch_tile * (h1 + h2) * bf16
    needed = x_tile + weights + biases + out_tile + scratch
    # Generation-aware ceiling: ~85% of physical VMEM (leaves headroom for
    # Mosaic internal scratch / semaphores): ~54 MiB on v7x, ~108 MiB on
    # v5e/v6e.  Conservative fallback if the query is unavailable.
    try:
        cap = int(0.85 * pltpu.get_tpu_info().vmem_capacity_bytes)
    except Exception:  # pragma: no cover - older jax / non-TPU trace
        cap = int(0.85 * (64 << 20))
    floor = min(32 << 20, cap)
    return int(min(max(2 * needed, floor), cap))


def classifier_forward(x, params, *, batch_tile=256, out_dtype=jnp.float32):
    """Fused 3-layer MLP classifier (inference).

    x:      [B, in_size] float32
    params: dict with w1 [in,512], b1 [1,512], w2 [512,256], b2 [1,256],
            w3 [256,n_labels], b3 [1,n_labels]  (all float32)
    returns [B, n_labels] softmax probabilities in `out_dtype`.

    Note: matmuls run in bf16 with f32 accumulation (~3e-2 abs error vs a pure
    f32 reference); softmax math stays in f32.
    """
    w1, b1 = params["w1"], params["b1"]
    w2, b2 = params["w2"], params["b2"]
    w3, b3 = params["w3"], params["b3"]

    B, in_size = x.shape
    h1 = w1.shape[1]
    h2 = w2.shape[1]
    n_labels = w3.shape[1]

    tile = _pick_batch_tile(B, batch_tile)

    # Pad batch up to a tile multiple (padded rows are zeros, sliced off later).
    b_pad = _round_up(B, tile)
    x_p = x if b_pad == B else jnp.pad(x, ((0, b_pad - B), (0, 0)))

    # Pad label axis to a lane-dense multiple of 128.  Padded weight columns
    # are zero and padded biases are -1e30 so those logits never win.
    n_pad = _round_up(max(n_labels, 128), 128)
    if n_pad != n_labels:
        w3_p = jnp.pad(w3, ((0, 0), (0, n_pad - n_labels)))
        b3_p = jnp.pad(b3, ((0, 0), (0, n_pad - n_labels)),
                       constant_values=_NEG_BIG)
    else:
        w3_p, b3_p = w3, b3

    # bf16 weights for the MXU; x stays f32 (cast in-kernel); biases f32.
    w1_bf = w1.astype(jnp.bfloat16)
    w2_bf = w2.astype(jnp.bfloat16)
    w3_bf = w3_p.astype(jnp.bfloat16)
    b1_f = b1.astype(jnp.float32)
    b2_f = b2.astype(jnp.float32)
    b3_f = b3_p.astype(jnp.float32)

    grid = (b_pad // tile,)
    out_bytes = jnp.dtype(out_dtype).itemsize

    cost = pl.CostEstimate(
        flops=2 * b_pad * (in_size * h1 + h1 * h2 + h2 * n_pad),
        transcendentals=b_pad * n_pad,
        bytes_accessed=(b_pad * in_size * 4
                        + (in_size * h1 + h1 * h2 + h2 * n_pad) * 2
                        + (h1 + h2 + n_pad) * 4
                        + b_pad * n_pad * out_bytes),
    )

    out = pl.pallas_call(
        classifier_kernel,
        out_shape=jax.ShapeDtypeStruct((b_pad, n_pad), out_dtype),
        grid_spec=pltpu.PrefetchScalarGridSpec(
            num_scalar_prefetch=0,
            grid=grid,
            in_specs=[
                pl.BlockSpec((tile, in_size), lambda i: (i, 0)),   # x (f32)
                pl.BlockSpec((in_size, h1), lambda i: (0, 0)),     # w1
                pl.BlockSpec((1, h1), lambda i: (0, 0)),           # b1
                pl.BlockSpec((h1, h2), lambda i: (0, 0)),          # w2
                pl.BlockSpec((1, h2), lambda i: (0, 0)),           # b2
                pl.BlockSpec((h2, n_pad), lambda i: (0, 0)),       # w3
                pl.BlockSpec((1, n_pad), lambda i: (0, 0)),        # b3
            ],
            out_specs=pl.BlockSpec((tile, n_pad), lambda i: (i, 0)),
            scratch_shapes=[
                pltpu.VMEM((tile, h1), jnp.bfloat16),   # h1 activations
                pltpu.VMEM((tile, h2), jnp.bfloat16),   # h2 activations
            ],
        ),
        compiler_params=pltpu.CompilerParams(
            dimension_semantics=("parallel",),
            vmem_limit_bytes=_vmem_limit_bytes(
                tile, in_size, h1, h2, n_pad, out_bytes),
        ),
        cost_estimate=cost,
    )(x_p, w1_bf, b1_f, w2_bf, b2_f, w3_bf, b3_f)

    return out[:B, :n_labels]


def init_params(key, in_size, n_labels):
    """Deterministic synthetic init (matches the layer shapes of the module)."""
    k1, k2, k3, k4, k5, k6 = jax.random.split(key, 6)
    s1 = 1.0 / jnp.sqrt(in_size)
    s2 = 1.0 / jnp.sqrt(512.0)
    s3 = 1.0 / jnp.sqrt(256.0)
    return {
        "w1": jax.random.uniform(k1, (in_size, 512), jnp.float32, -s1, s1),
        "b1": jax.random.uniform(k2, (1, 512), jnp.float32, -s1, s1),
        "w2": jax.random.uniform(k3, (512, 256), jnp.float32, -s2, s2),
        "b2": jax.random.uniform(k4, (1, 256), jnp.float32, -s2, s2),
        "w3": jax.random.uniform(k5, (256, n_labels), jnp.float32, -s3, s3),
        "b3": jax.random.uniform(k6, (1, n_labels), jnp.float32, -s3, s3),
    }


def _reference(x, p):
    h = jnp.maximum(x @ p["w1"] + p["b1"], 0.0)
    h = jnp.maximum(h @ p["w2"] + p["b2"], 0.0)
    return jax.nn.softmax(h @ p["w3"] + p["b3"], axis=-1)


if __name__ == "__main__":
    key = jax.random.PRNGKey(0)
    kx, kp, kx2 = jax.random.split(key, 3)

    B, IN_SIZE, N_LABELS = 8, 128, 16
    x = jax.random.normal(kx, (B, IN_SIZE), dtype=jnp.float32)
    params = init_params(kp, IN_SIZE, N_LABELS)

    # small-batch path (tile shrinks to 16 rows, single grid step)
    out = jax.block_until_ready(classifier_forward(x, params))
    expected = _reference(x, params)
    assert out.shape == (B, N_LABELS)
    # bf16 matmuls -> loose tolerance vs the f32 reference
    assert jnp.allclose(out, expected, atol=3e-2, rtol=3e-2)
    assert jnp.allclose(jnp.sum(out, axis=-1), 1.0, atol=1e-3)

    # larger, non-multiple batch path (exercises padding + >=2 grid steps)
    B2 = 300
    x2 = jax.random.normal(kx2, (B2, IN_SIZE), dtype=jnp.float32)
    out2 = jax.block_until_ready(classifier_forward(x2, params))
    expected2 = _reference(x2, params)
    assert out2.shape == (B2, N_LABELS)
    assert jnp.allclose(out2, expected2, atol=3e-2, rtol=3e-2)
    assert jnp.allclose(jnp.sum(out2, axis=-1), 1.0, atol=1e-3)

    print("KERNEL_OK")
</pallas_src>

<mosaic_0001>
module attributes {stable_mosaic.version = 11 : i64} {
  func.func @classifier_kernel(%arg0: i32, %arg1: memref<16x128xf32, #tpu.memory_space<vmem>>, %arg2: memref<128x512xbf16, #tpu.memory_space<vmem>>, %arg3: memref<1x512xf32, #tpu.memory_space<vmem>>, %arg4: memref<512x256xbf16, #tpu.memory_space<vmem>>, %arg5: memref<1x256xf32, #tpu.memory_space<vmem>>, %arg6: memref<256x128xbf16, #tpu.memory_space<vmem>>, %arg7: memref<1x128xf32, #tpu.memory_space<vmem>>, %arg8: memref<16x128xf32, #tpu.memory_space<vmem>>, %arg9: memref<16x512xbf16, #tpu.memory_space<vmem>>, %arg10: memref<16x256xbf16, #tpu.memory_space<vmem>>) attributes {dimension_semantics = [#tpu.dimension_semantics<parallel>], iteration_bounds = array<i64: 1>, scalar_prefetch = 0 : i64, scratch_operands = 2 : i64, tpu.core_type = #tpu.core_type<tc>, window_params = [{transform_indices = @transform_0, window_bounds = array<i64: 16, 128>}, {pipeline_mode = #tpu.pipeline_mode<synchronous>, transform_indices = @transform_1, window_bounds = array<i64: 128, 512>}, {pipeline_mode = #tpu.pipeline_mode<synchronous>, transform_indices = @transform_2, window_bounds = array<i64: 1, 512>}, {pipeline_mode = #tpu.pipeline_mode<synchronous>, transform_indices = @transform_3, window_bounds = array<i64: 512, 256>}, {pipeline_mode = #tpu.pipeline_mode<synchronous>, transform_indices = @transform_4, window_bounds = array<i64: 1, 256>}, {pipeline_mode = #tpu.pipeline_mode<synchronous>, transform_indices = @transform_5, window_bounds = array<i64: 256, 128>}, {pipeline_mode = #tpu.pipeline_mode<synchronous>, transform_indices = @transform_6, window_bounds = array<i64: 1, 128>}, {transform_indices = @transform_7, window_bounds = array<i64: 16, 128>}]} {
    %c0 = arith.constant 0 : index
    %c0_0 = arith.constant 0 : index
    %0 = vector.load %arg1[%c0, %c0_0] : memref<16x128xf32, #tpu.memory_space<vmem>>, vector<16x128xf32>
    %1 = arith.truncf %0 : vector<16x128xf32> to vector<16x128xbf16>
    %c0_1 = arith.constant 0 : index
    %c0_2 = arith.constant 0 : index
    %2 = vector.load %arg2[%c0_1, %c0_2] : memref<128x512xbf16, #tpu.memory_space<vmem>>, vector<128x512xbf16>
    %cst = arith.constant dense<0.000000e+00> : vector<16x512xf32>
    %3 = tpu.matmul %1, %2, %cst {dimension_numbers = #tpu.dot_dimension_numbers<[1], [0], [0], [1], [0, 0, 1, 1], [], []>} : vector<16x128xbf16>, vector<128x512xbf16>, vector<16x512xf32> -> vector<16x512xf32>
    %c0_3 = arith.constant 0 : index
    %c0_4 = arith.constant 0 : index
    %4 = vector.load %arg3[%c0_3, %c0_4] : memref<1x512xf32, #tpu.memory_space<vmem>>, vector<1x512xf32>
    %5 = vector.broadcast %4 : vector<1x512xf32> to vector<16x512xf32>
    %6 = arith.addf %3, %5 : vector<16x512xf32>
    %cst_5 = arith.constant 0.000000e+00 : f32
    %7 = vector.broadcast %cst_5 : f32 to vector<16x512xf32>
    %8 = arith.maximumf %6, %7 : vector<16x512xf32>
    %9 = arith.truncf %8 : vector<16x512xf32> to vector<16x512xbf16>
    %c0_6 = arith.constant 0 : index
    %c0_7 = arith.constant 0 : index
    %10 = vector.load %arg9[%c0_6, %c0_7] : memref<16x512xbf16, #tpu.memory_space<vmem>>, vector<16x512xbf16>
    tpu.vector_store %arg9[%c0_6, %c0_7], %9 {strides = array<i32>} : memref<16x512xbf16, #tpu.memory_space<vmem>>, vector<16x512xbf16>,
    %c0_8 = arith.constant 0 : index
    %c0_9 = arith.constant 0 : index
    %11 = vector.load %arg9[%c0_8, %c0_9] : memref<16x512xbf16, #tpu.memory_space<vmem>>, vector<16x512xbf16>
    %c0_10 = arith.constant 0 : index
    %c0_11 = arith.constant 0 : index
    %12 = vector.load %arg4[%c0_10, %c0_11] : memref<512x256xbf16, #tpu.memory_space<vmem>>, vector<512x256xbf16>
    %cst_12 = arith.constant dense<0.000000e+00> : vector<16x256xf32>
    %13 = tpu.matmul %11, %12, %cst_12 {dimension_numbers = #tpu.dot_dimension_numbers<[1], [0], [0], [1], [0, 0, 1, 1], [], []>} : vector<16x512xbf16>, vector<512x256xbf16>, vector<16x256xf32> -> vector<16x256xf32>
    %c0_13 = arith.constant 0 : index
    %c0_14 = arith.constant 0 : index
    %14 = vector.load %arg5[%c0_13, %c0_14] : memref<1x256xf32, #tpu.memory_space<vmem>>, vector<1x256xf32>
    %15 = vector.broadcast %14 : vector<1x256xf32> to vector<16x256xf32>
    %16 = arith.addf %13, %15 : vector<16x256xf32>
    %cst_15 = arith.constant 0.000000e+00 : f32
    %17 = vector.broadcast %cst_15 : f32 to vector<16x256xf32>
    %18 = arith.maximumf %16, %17 : vector<16x256xf32>
    %19 = arith.truncf %18 : vector<16x256xf32> to vector<16x256xbf16>
    %c0_16 = arith.constant 0 : index
    %c0_17 = arith.constant 0 : index
    %20 = vector.load %arg10[%c0_16, %c0_17] : memref<16x256xbf16, #tpu.memory_space<vmem>>, vector<16x256xbf16>
    tpu.vector_store %arg10[%c0_16, %c0_17], %19 {strides = array<i32>} : memref<16x256xbf16, #tpu.memory_space<vmem>>, vector<16x256xbf16>,
    %c0_18 = arith.constant 0 : index
    %c0_19 = arith.constant 0 : index
    %21 = vector.load %arg10[%c0_18, %c0_19] : memref<16x256xbf16, #tpu.memory_space<vmem>>, vector<16x256xbf16>
    %c0_20 = arith.constant 0 : index
    %c0_21 = arith.constant 0 : index
    %22 = vector.load %arg6[%c0_20, %c0_21] : memref<256x128xbf16, #tpu.memory_space<vmem>>, vector<256x128xbf16>
    %cst_22 = arith.constant dense<0.000000e+00> : vector<16x128xf32>
    %23 = tpu.matmul %21, %22, %cst_22 {dimension_numbers = #tpu.dot_dimension_numbers<[1], [0], [0], [1], [0, 0, 1, 1], [], []>} : vector<16x256xbf16>, vector<256x128xbf16>, vector<16x128xf32> -> vector<16x128xf32>
    %c0_23 = arith.constant 0 : index
    %c0_24 = arith.constant 0 : index
    %24 = vector.load %arg7[%c0_23, %c0_24] : memref<1x128xf32, #tpu.memory_space<vmem>>, vector<1x128xf32>
    %25 = vector.broadcast %24 : vector<1x128xf32> to vector<16x128xf32>
    %26 = arith.addf %23, %25 : vector<16x128xf32>
    %cst_25 = arith.constant dense<0xFF800000> : vector<16xf32>
    %27 = vector.multi_reduction <maximumf>, %26, %cst_25 [1] : vector<16x128xf32> to vector<16xf32>
    %28 = vector.shape_cast %27 : vector<16xf32> to vector<16x1xf32>
    %29 = vector.broadcast %28 : vector<16x1xf32> to vector<16x128xf32>
    %30 = arith.subf %26, %29 : vector<16x128xf32>
    %31 = math.exp %30 : vector<16x128xf32>
    %cst_26 = arith.constant dense<0.000000e+00> : vector<16xf32>
    %32 = vector.multi_reduction <add>, %31, %cst_26 [1] : vector<16x128xf32> to vector<16xf32>
    %33 = vector.shape_cast %32 : vector<16xf32> to vector<16x1xf32>
    %34 = tpu.reciprocal %33 {approx = true} : vector<16x1xf32> -> vector<16x1xf32>
    %35 = arith.mulf %33, %34 : vector<16x1xf32>
    %cst_27 = arith.constant 2.000000e+00 : f32
    %36 = vector.broadcast %cst_27 : f32 to vector<16x1xf32>
    %37 = arith.subf %36, %35 : vector<16x1xf32>
    %38 = arith.mulf %34, %37 : vector<16x1xf32>
    %39 = vector.broadcast %38 : vector<16x1xf32> to vector<16x128xf32>
    %40 = arith.mulf %31, %39 : vector<16x128xf32>
    %c0_28 = arith.constant 0 : index
    %c0_29 = arith.constant 0 : index
    %41 = vector.load %arg8[%c0_28, %c0_29] : memref<16x128xf32, #tpu.memory_space<vmem>>, vector<16x128xf32>
    tpu.vector_store %arg8[%c0_28, %c0_29], %40 {strides = array<i32>} : memref<16x128xf32, #tpu.memory_space<vmem>>, vector<16x128xf32>,
    return
  }
  func.func @transform_0(%arg0: i32) -> (i32, i32) {
    %c0_i32 = arith.constant 0 : i32
    %c0_i32_0 = arith.constant 0 : i32
    return %arg0, %c0_i32 : i32, i32
  }
  func.func @transform_1(%arg0: i32) -> (i32, i32) {
    %c0_i32 = arith.constant 0 : i32
    %c0_i32_0 = arith.constant 0 : i32
    %c0_i32_1 = arith.constant 0 : i32
    return %c0_i32, %c0_i32_0 : i32, i32
  }
  func.func @transform_2(%arg0: i32) -> (i32, i32) {
    %c0_i32 = arith.constant 0 : i32
    %c0_i32_0 = arith.constant 0 : i32
    %c0_i32_1 = arith.constant 0 : i32
    return %c0_i32, %c0_i32_0 : i32, i32
  }
  func.func @transform_3(%arg0: i32) -> (i32, i32) {
    %c0_i32 = arith.constant 0 : i32
    %c0_i32_0 = arith.constant 0 : i32
    %c0_i32_1 = arith.constant 0 : i32
    return %c0_i32, %c0_i32_0 : i32, i32
  }
  func.func @transform_4(%arg0: i32) -> (i32, i32) {
    %c0_i32 = arith.constant 0 : i32
    %c0_i32_0 = arith.constant 0 : i32
    %c0_i32_1 = arith.constant 0 : i32
    return %c0_i32, %c0_i32_0 : i32, i32
  }
  func.func @transform_5(%arg0: i32) -> (i32, i32) {
    %c0_i32 = arith.constant 0 : i32
    %c0_i32_0 = arith.constant 0 : i32
    %c0_i32_1 = arith.constant 0 : i32
    return %c0_i32, %c0_i32_0 : i32, i32
  }
  func.func @transform_6(%arg0: i32) -> (i32, i32) {
    %c0_i32 = arith.constant 0 : i32
    %c0_i32_0 = arith.constant 0 : i32
    %c0_i32_1 = arith.constant 0 : i32
    return %c0_i32, %c0_i32_0 : i32, i32
  }
  func.func @transform_7(%arg0: i32) -> (i32, i32) {
    %c0_i32 = arith.constant 0 : i32
    %c0_i32_0 = arith.constant 0 : i32
    return %arg0, %c0_i32 : i32, i32
  }
}

</mosaic_0001>

<bundles_post_ra>
// kernel: tpu_custom_call.1
= control target key start
LH: loop header
LB: loop body
LE: loop exit
PB: predicated region body
PF: predicated region fallthrough
CT: control target
= control target key end

     0   :  { %12 = vsyncpa [#allocation5], 0  ;;  %s1987_s0 = inlined_call_operand.hbm [shape: f32[16,128], index: 0, kind: input, shape index: {}]   ;;  %s1988_s1 = inlined_call_operand.hbm [shape: bf16[128,512], index: 1, kind: input, shape index: {}]   ;;  %s1989_s2 = inlined_call_operand.hbm [shape: f32[1,512], index: 2, kind: input, shape index: {}]   ;;  %s1990_s3 = inlined_call_operand.hbm [shape: bf16[512,256], index: 3, kind: input, shape index: {}]   ;;  %s1991_s4 = inlined_call_operand.vmem [shape: f32[1,256], index: 4, kind: input, shape index: {}]   ;;  %s1992_s5 = inlined_call_operand.hbm [shape: bf16[256,128], index: 5, kind: input, shape index: {}]   ;;  %s1993_s6 = inlined_call_operand.vmem [shape: f32[1,128], index: 6, kind: input, shape index: {}]   ;;  %s1994_s7 = inlined_call_operand.hbm [shape: f32[16,128], index: 7, kind: output, shape index: {}]  }
   0x1   :  { %13 = vsyncpa [#allocation8], 0 }
   0x2   :  { %14 = vsyncpa [#allocation11], 0  ;;  %s33_s26 = sshll.u32 %s1988_s1, 4  ;;  %s34_s26 = int_to_ptr.hbm [resolvable:$true] %s33_s26 }
   0x3   :  { %15 = vsyncpa [#allocation6], 0  ;;  %s1896_s27 = smov [#allocation7]   ;;  %s1897_s29 = smov 256  }
   0x4   :  { %s35_s28 = sshll.u32 %s1896_s27, 4  ;;  %s1898_s30 = smov 16   ;;  %s36_s28 = int_to_ptr.vmem [resolvable:$true] %s35_s28 }
   0x5   :  { %41 = dma.hbm_to_vmem [thread:$0]  %s34_s26, 4096, %s36_s28, [#allocation8], %s1897_s29, %s1897_s29, %s1898_s30  }
   0x6   :  { %s57_s10 = sshll.u32 %s1990_s3, 4  ;;  %s1899_s11 = smov [#allocation10]   ;;  %s58_s10 = int_to_ptr.hbm [resolvable:$true] %s57_s10 }
   0x7   :  { %s59_s12 = sshll.u32 %s1899_s11, 4  ;;  %s20_s15 = sshll.u32 %s1987_s0, 4  ;;  %s60_s12 = int_to_ptr.vmem [resolvable:$true] %s59_s12  ;;  %s21_s15 = int_to_ptr.hbm [resolvable:$true] %s20_s15 }
   0x8   :  { %s1900_s1 = smov 128   ;;  %s1901_s16 = smov 8  }
   0x9   :  { %65 = dma.hbm_to_vmem [thread:$0]  %s58_s10, 8192, %s60_s12, [#allocation11], %s1900_s1, %s1900_s1, %s1901_s16  }
   0xa   :  { %s47_s19 = sshll.u32 %s1989_s2, 4  ;;  %s1902_s3 = smov [#allocation4]   ;;  %s48_s19 = int_to_ptr.hbm [resolvable:$true] %s47_s19 }
   0xb   :  { %s22_s20 = sshll.u32 %s1902_s3, 4  ;;  %s1903_s0 = smov [#allocation9]   ;;  %s23_s20 = int_to_ptr.vmem [resolvable:$true] %s22_s20 }
   0xc   :  { %28 = dma.hbm_to_vmem [thread:$0]  %s21_s15, 256, %s23_s20, [#allocation5], %s1900_s1, %s1900_s1, %s1901_s16  }
   0xd   :  { %s49_s21 = sshll.u32 %s1903_s0, 4  ;;  %s72_s24 = sshll.u32 %s1992_s5, 4  ;;  %s50_s21 = int_to_ptr.vmem [resolvable:$true] %s49_s21  ;;  %s73_s24 = int_to_ptr.hbm [resolvable:$true] %s72_s24 }
   0xe   :  { %52 = dma.hbm_to_vmem [thread:$0]  %s48_s19, 64, %s50_s21, [#allocation8]  }
   0xf   :  { %s1904_s25 = smov [#allocation12]   ;;  %s1905_s2 = smov 64  }
  0x10   :  { %s74_s26 = sshll.u32 %s1904_s25, 4  ;;  %s1906_s27 = smov 4   ;;  %s75_s26 = int_to_ptr.vmem [resolvable:$true] %s74_s26 }
  0x11   :  { %80 = dma.hbm_to_vmem [thread:$0]  %s73_s24, 2048, %s75_s26, [#allocation11], %s1905_s2, %s1905_s2, %s1906_s27  }
  0x12   :  { %1888 = dma.done.wait [#allocation5], 256  }
  0x13   :  { %1889 = vsyncadd [#allocation5], 4294967040 }
  0x14   :  { %1890 = dma.done.wait [#allocation8], 4160  }
  0x15   :  { %1891 = vsyncadd [#allocation8], 4294963136 }
  0x16   :  { %1892 = dma.done.wait [#allocation11], 10240  }
  0x17   :  { %1893 = vsyncadd [#allocation11], 4294957056  ;;  %v1247_v0 = vld [vmem:[#allocation7 + $0xe0] sm:$0xf]  ;;  %v1635_v1 = vld [vmem:[#allocation7 + $0xec] sm:$0xf0] }
  0x18   :  { %v1633_v2 = vld [vmem:[#allocation7 + $0xe4] sm:$0xf]  ;;  %v1248_v3 = vor.u32 %v1635_v1, %v1247_v0  ;;  %v1249_v4 = vld [vmem:[#allocation7 + $0xf0] sm:$0xf0]  ;;  %v1255_v5 = vld [vmem:[#allocation7 + $0xe8] sm:$0xf] }
  0x19   :  { %v1636_v6 = vld [vmem:[#allocation7 + $0xf4] sm:$0xf0]  ;;  %v1252_v7 = vor.u32 %v1633_v2, %v1249_v4  ;;  %v1634_v9 = vld [vmem:[#allocation7 + $0xec] sm:$0xf]  ;;  %v1257_v10 = vld [vmem:[#allocation7 + $0xf8] sm:$0xf0] }
  0x1a   :  { %v1256_v8 = vor.u32 %v1636_v6, %v1255_v5  ;;  %v1231_v11 = vld [vmem:[#allocation7 + $0xc0] sm:$0xf]  ;;  %308 = vmatpush.bf16.msra.mxu0 %v1248_v3  ;;  %v1260_v12 = vor.u32 %v1634_v9, %v1257_v10  ;;  %v1631_v13 = vld [vmem:[#allocation7 + $0xcc] sm:$0xf0]  ;;  %v1629_v14 = vld [vmem:[#allocation7 + $0xc4] sm:$0xf] }
  0x1b   :  { %v1233_v15 = vld [vmem:[#allocation7 + $0xd0] sm:$0xf0]  ;;  %322 = vmatpush.bf16.msra.mxu1 %v1252_v7  ;;  %v1232_v16 = vor.u32 %v1631_v13, %v1231_v11  ;;  %v1239_v18 = vld [vmem:[#allocation7 + $0xc8] sm:$0xf]  ;;  %v1632_v19 = vld [vmem:[#allocation7 + $0xd4] sm:$0xf0] }
  0x1c   :  { %336 = vmatpush.bf16.msra.mxu2 %v1256_v8  ;;  %v1236_v17 = vor.u32 %v1629_v14, %v1233_v15  ;;  %v1630_v20 = vld [vmem:[#allocation7 + $0xcc] sm:$0xf]  ;;  %350 = vmatpush.bf16.msra.mxu3 %v1260_v12  ;;  %v1240_v21 = vor.u32 %v1632_v19, %v1239_v18  ;;  %v1241_v22 = vld [vmem:[#allocation7 + $0xd8] sm:$0xf0]  ;;  %v1215_v23 = vld [vmem:[#allocation7 + $0xa0] sm:$0xf] }
  0x1d   :  { %v1627_v24 = vld [vmem:[#allocation7 + $0xac] sm:$0xf0]  ;;  %v1244_v25 = vor.u32 %v1630_v20, %v1241_v22  ;;  %v1625_v26 = vld [vmem:[#allocation7 + $0xa4] sm:$0xf]  ;;  %v1217_v27 = vld [vmem:[#allocation7 + $0xb0] sm:$0xf0] }
  0x1e   :  { %v1223_v28 = vld [vmem:[#allocation7 + $0xa8] sm:$0xf]  ;;  %309 = vmatpush.bf16.msra.mxu0 %v1232_v16  ;;  %v1216_v29 = vor.u32 %v1627_v24, %v1215_v23  ;;  %v1628_v30 = vld [vmem:[#allocation7 + $0xb4] sm:$0xf0]  ;;  %v1626_v31 = vld [vmem:[#allocation7 + $0xac] sm:$0xf]  ;;  %v1220_v33 = vor.u32 %v1625_v26, %v1217_v27 }
  0x1f   :  { %v1225_v32 = vld [vmem:[#allocation7 + $0xb8] sm:$0xf0]  ;;  %323 = vmatpush.bf16.msra.mxu1 %v1236_v17  ;;  %v1224_v34 = vor.u32 %v1628_v30, %v1223_v28  ;;  %v1199_v35 = vld [vmem:[#allocation7 + $0x80] sm:$0xf]  ;;  %v1623_v36 = vld [vmem:[#allocation7 + $0x8c] sm:$0xf0] }
  0x20   :  { %337 = vmatpush.bf16.msra.mxu2 %v1240_v21  ;;  %v1621_v37 = vld [vmem:[#allocation7 + $0x84] sm:$0xf]  ;;  %351 = vmatpush.bf16.msra.mxu3 %v1244_v25  ;;  %v1228_v38 = vor.u32 %v1626_v31, %v1225_v32  ;;  %v1201_v39 = vld [vmem:[#allocation7 + $0x90] sm:$0xf0]  ;;  %v1207_v40 = vld [vmem:[#allocation7 + $0x88] sm:$0xf]  ;;  %v1200_v44 = vor.u32 %v1623_v36, %v1199_v35 }
  0x21   :  { %v1624_v41 = vld [vmem:[#allocation7 + $0x94] sm:$0xf0]  ;;  %v1622_v42 = vld [vmem:[#allocation7 + $0x8c] sm:$0xf]  ;;  %v1209_v43 = vld [vmem:[#allocation7 + $0x98] sm:$0xf0]  ;;  %v1204_v45 = vor.u32 %v1621_v37, %v1201_v39 }
  0x22   :  { %310 = vmatpush.bf16.msra.mxu0 %v1216_v29  ;;  %v1208_v46 = vor.u32 %v1624_v41, %v1207_v40  ;;  %v1183_v47 = vld [vmem:[#allocation7 + $0x60] sm:$0xf]  ;;  %v1619_v48 = vld [vmem:[#allocation7 + $0x6c] sm:$0xf0]  ;;  %v1617_v49 = vld [vmem:[#allocation7 + $0x64] sm:$0xf]  ;;  %v1212_v50 = vor.u32 %v1622_v42, %v1209_v43 }
  0x23   :  { %324 = vmatpush.bf16.msra.mxu1 %v1220_v33  ;;  %v1185_v51 = vld [vmem:[#allocation7 + $0x70] sm:$0xf0]  ;;  %v1191_v52 = vld [vmem:[#allocation7 + $0x68] sm:$0xf]  ;;  %v1620_v53 = vld [vmem:[#allocation7 + $0x74] sm:$0xf0]  ;;  %v1184_v56 = vor.u32 %v1619_v48, %v1183_v47 }
  0x24   :  { %338 = vmatpush.bf16.msra.mxu2 %v1224_v34  ;;  %352 = vmatpush.bf16.msra.mxu3 %v1228_v38  ;;  %v1618_v54 = vld [vmem:[#allocation7 + $0x6c] sm:$0xf]  ;;  %v1193_v55 = vld [vmem:[#allocation7 + $0x78] sm:$0xf0]  ;;  %v1188_v57 = vor.u32 %v1617_v49, %v1185_v51  ;;  %v1192_v58 = vor.u32 %v1620_v53, %v1191_v52  ;;  %v1167_v59 = vld [vmem:[#allocation7 + $0x40] sm:$0xf] }
  0x25   :  { %v1615_v60 = vld [vmem:[#allocation7 + $0x4c] sm:$0xf0]  ;;  %v1613_v61 = vld [vmem:[#allocation7 + $0x44] sm:$0xf]  ;;  %v1196_v62 = vor.u32 %v1618_v54, %v1193_v55  ;;  %v1169_v63 = vld [vmem:[#allocation7 + $0x50] sm:$0xf0] }
  0x26   :  { %311 = vmatpush.bf16.msra.mxu0 %v1200_v44  ;;  %v1175_v0 = vld [vmem:[#allocation7 + $0x48] sm:$0xf]  ;;  %v1616_v1 = vld [vmem:[#allocation7 + $0x54] sm:$0xf0]  ;;  %v1614_v2 = vld [vmem:[#allocation7 + $0x4c] sm:$0xf]  ;;  %v1168_v4 = vor.u32 %v1615_v60, %v1167_v59  ;;  %v1172_v5 = vor.u32 %v1613_v61, %v1169_v63 }
  0x27   :  { %325 = vmatpush.bf16.msra.mxu1 %v1204_v45  ;;  %v1177_v3 = vld [vmem:[#allocation7 + $0x58] sm:$0xf0]  ;;  %v1176_v6 = vor.u32 %v1616_v1, %v1175_v0  ;;  %v1151_v7 = vld [vmem:[#allocation7 + $0x20] sm:$0xf]  ;;  %v1611_v8 = vld [vmem:[#allocation7 + $0x2c] sm:$0xf0] }
  0x28   :  { %339 = vmatpush.bf16.msra.mxu2 %v1208_v46  ;;  %353 = vmatpush.bf16.msra.mxu3 %v1212_v50  ;;  %v1609_v9 = vld [vmem:[#allocation7 + $0x24] sm:$0xf]  ;;  %v1180_v10 = vor.u32 %v1614_v2, %v1177_v3  ;;  %v1153_v11 = vld [vmem:[#allocation7 + $0x30] sm:$0xf0]  ;;  %v1159_v12 = vld [vmem:[#allocation7 + $0x28] sm:$0xf]  ;;  %v1152_v16 = vor.u32 %v1611_v8, %v1151_v7 }
  0x29   :  { %v1612_v13 = vld [vmem:[#allocation7 + $0x34] sm:$0xf0]  ;;  %v1610_v14 = vld [vmem:[#allocation7 + $0x2c] sm:$0xf]  ;;  %v1161_v15 = vld [vmem:[#allocation7 + $0x38] sm:$0xf0]  ;;  %v1156_v19 = vor.u32 %v1609_v9, %v1153_v11 }
  0x2a   :  { %312 = vmatpush.bf16.msra.mxu0 %v1184_v56  ;;  %v1135_v17 = vld [vmem:[#allocation7] sm:$0xf]  ;;  %v1607_v18 = vld [vmem:[#allocation7 + $0xc] sm:$0xf0]  ;;  %v1160_v20 = vor.u32 %v1612_v13, %v1159_v12  ;;  %v1605_v21 = vld [vmem:[#allocation7 + $0x4] sm:$0xf]  ;;  %v1164_v24 = vor.u32 %v1610_v14, %v1161_v15 }
  0x2b   :  { %326 = vmatpush.bf16.msra.mxu1 %v1188_v57  ;;  %v1137_v22 = vld [vmem:[#allocation7 + $0x10] sm:$0xf0]  ;;  %v1143_v23 = vld [vmem:[#allocation7 + $0x8] sm:$0xf]  ;;  %v1608_v25 = vld [vmem:[#allocation7 + $0x14] sm:$0xf0]  ;;  %v1136_v31 = vor.u32 %v1607_v18, %v1135_v17 }
  0x2c   :  { %340 = vmatpush.bf16.msra.mxu2 %v1192_v58  ;;  %354 = vmatpush.bf16.msra.mxu3 %v1196_v62  ;;  %v1606_v26 = vld [vmem:[#allocation7 + $0xc] sm:$0xf]  ;;  %v1145_v27 = vld [vmem:[#allocation7 + $0x18] sm:$0xf0]  ;;  %v103_v28 = vld [vmem:[#allocation4] sm:$0xff]  ;;  %v1140_v35 = vor.u32 %v1605_v21, %v1137_v22  ;;  %v1144_v36 = vor.u32 %v1608_v25, %v1143_v23  ;;  %s1118_s10 = sshll.u32 %s1994_s7, 4  ;;  %s1119_s10 = int_to_ptr.hbm [resolvable:$true] %s1118_s10 }
  0x2d   :  { %v1335_v29 = vld [vmem:[#allocation10 + $0x70] sm:$0xf]  ;;  %v1656_v30 = vld [vmem:[#allocation10 + $0x74] sm:$0xf0]  ;;  %v1148_v37 = vor.u32 %v1606_v26, %v1145_v27  ;;  %v1327_v39 = vld [vmem:[#allocation10 + $0x60] sm:$0xf] }
  0x2e   :  { %313 = vmatpush.bf16.msra.mxu0 %v1168_v4  ;;  %v104_v32 = vld [vmem:[#allocation4 + $0x8] sm:$0xff]  ;;  %v1399_v33 = vld [vmem:[#allocation10 + $0xf0] sm:$0xf]  ;;  %v1336_v38 = vor.u32 %v1656_v30, %v1335_v29  ;;  %v1654_v44 = vld [vmem:[#allocation10 + $0x64] sm:$0xf0] }
  0x2f   :  { %327 = vmatpush.bf16.msra.mxu1 %v1172_v5  ;;  %v1672_v34 = vld [vmem:[#allocation10 + $0xf4] sm:$0xf0]  ;;  %v1463_v40 = vld [vmem:[#allocation10 + $0x170] sm:$0xf]  ;;  %v105_v42 = vpack.c.bf16 %v104_v32, %v103_v28  ;;  %v1391_v47 = vld [vmem:[#allocation10 + $0xe0] sm:$0xf]  ;;  %v1328_v51 = vor.u32 %v1654_v44, %v1327_v39 }
  0x30   :  { %341 = vmatpush.bf16.msra.mxu2 %v1176_v6  ;;  %355 = vmatpush.bf16.msra.mxu3 %v1180_v10  ;;  %v1688_v41 = vld [vmem:[#allocation10 + $0x174] sm:$0xf0]  ;;  %v1400_v43 = vor.u32 %v1672_v34, %v1399_v33  ;;  %v1527_v45 = vld [vmem:[#allocation10 + $0x1f0] sm:$0xf]  ;;  %v1670_v48 = vld [vmem:[#allocation10 + $0xe4] sm:$0xf0] }
  0x31   :  { %v1704_v46 = vld [vmem:[#allocation10 + $0x1f4] sm:$0xf0]  ;;  %v1464_v49 = vor.u32 %v1688_v41, %v1463_v40  ;;  %v1319_v50 = vld [vmem:[#allocation10 + $0x50] sm:$0xf]  ;;  %v1455_v54 = vld [vmem:[#allocation10 + $0x160] sm:$0xf]  ;;  %v1392_v56 = vor.u32 %v1670_v48, %v1391_v47 }
  0x32   :  { %314 = vmatpush.bf16.msra.mxu0 %v1152_v16  ;;  %v1528_v52 = vor.u32 %v1704_v46, %v1527_v45  ;;  %v1652_v53 = vld [vmem:[#allocation10 + $0x54] sm:$0xf0]  ;;  %v1686_v55 = vld [vmem:[#allocation10 + $0x164] sm:$0xf0]  ;;  %v1519_v57 = vld [vmem:[#allocation10 + $0x1e0] sm:$0xf] }
  0x33   :  { %328 = vmatpush.bf16.msra.mxu1 %v1156_v19  ;;  %v1702_v58 = vld [vmem:[#allocation10 + $0x1e4] sm:$0xf0]  ;;  %v1383_v59 = vld [vmem:[#allocation10 + $0xd0] sm:$0xf]  ;;  %v1668_v60 = vld [vmem:[#allocation10 + $0xd4] sm:$0xf0]  ;;  %v1456_v61 = vor.u32 %v1686_v55, %v1455_v54  ;;  %v1320_v62 = vor.u32 %v1652_v53, %v1319_v50 }
  0x34   :  { %342 = vmatpush.bf16.msra.mxu2 %v1160_v20  ;;  %356 = vmatpush.bf16.msra.mxu3 %v1164_v24  ;;  %v1520_v63 = vor.u32 %v1702_v58, %v1519_v57  ;;  %v1311_v0 = vld [vmem:[#allocation10 + $0x40] sm:$0xf]  ;;  %v1447_v1 = vld [vmem:[#allocation10 + $0x150] sm:$0xf]  ;;  %v1684_v2 = vld [vmem:[#allocation10 + $0x154] sm:$0xf0]  ;;  %v1384_v3 = vor.u32 %v1668_v60, %v1383_v59 }
  0x35   :  { %v1650_v4 = vld [vmem:[#allocation10 + $0x44] sm:$0xf0]  ;;  %v1511_v5 = vld [vmem:[#allocation10 + $0x1d0] sm:$0xf]  ;;  %v1700_v6 = vld [vmem:[#allocation10 + $0x1d4] sm:$0xf0]  ;;  %v1448_v9 = vor.u32 %v1684_v2, %v1447_v1 }
  0x36   :  { %315 = vmatpush.bf16.msra.mxu0 %v1136_v31  ;;  %v1375_v7 = vld [vmem:[#allocation10 + $0xc0] sm:$0xf]  ;;  %v1666_v8 = vld [vmem:[#allocation10 + $0xc4] sm:$0xf0]  ;;  %v1312_v10 = vor.u32 %v1650_v4, %v1311_v0  ;;  %v1512_v11 = vor.u32 %v1700_v6, %v1511_v5  ;;  %v1303_v12 = vld [vmem:[#allocation10 + $0x30] sm:$0xf] }
  0x37   :  { %329 = vmatpush.bf16.msra.mxu1 %v1140_v35  ;;  %v1439_v13 = vld [vmem:[#allocation10 + $0x140] sm:$0xf]  ;;  %v1682_v14 = vld [vmem:[#allocation10 + $0x144] sm:$0xf0]  ;;  %v1376_v15 = vor.u32 %v1666_v8, %v1375_v7  ;;  %v1648_v16 = vld [vmem:[#allocation10 + $0x34] sm:$0xf0] }
  0x38   :  { %343 = vmatpush.bf16.msra.mxu2 %v1144_v36  ;;  %357 = vmatpush.bf16.msra.mxu3 %v1148_v37  ;;  %v1503_v17 = vld [vmem:[#allocation10 + $0x1c0] sm:$0xf]  ;;  %v1698_v18 = vld [vmem:[#allocation10 + $0x1c4] sm:$0xf0]  ;;  %v1367_v19 = vld [vmem:[#allocation10 + $0xb0] sm:$0xf]  ;;  %v1440_v21 = vor.u32 %v1682_v14, %v1439_v13  ;;  %v1304_v22 = vor.u32 %v1648_v16, %v1303_v12 }
  0x39   :  { %316 = vmatmul.bf16.vlgmr.msra.gmra.mxu0 %v105_v42  ;;  %v1664_v20 = vld [vmem:[#allocation10 + $0xb4] sm:$0xf0]  ;;  %v1504_v23 = vor.u32 %v1698_v18, %v1503_v17  ;;  %v1295_v25 = vld [vmem:[#allocation10 + $0x20] sm:$0xf]  ;;  %v1646_v26 = vld [vmem:[#allocation10 + $0x24] sm:$0xf0] }
  0x3a   :  { %794 = vmatpush.bf16.msrb.mxu0 %v1336_v38  ;;  %330 = vmatmul.bf16.vlgmr.msra.gmra.mxu1 %v105_v42  ;;  %v1368_v24 = vor.u32 %v1664_v20, %v1367_v19  ;;  %v1359_v27 = vld [vmem:[#allocation10 + $0xa0] sm:$0xf]  ;;  %v1296_v28 = vor.u32 %v1646_v26, %v1295_v25  ;;  %v1662_v29 = vld [vmem:[#allocation10 + $0xa4] sm:$0xf0]  ;;  %v1431_v31 = vld [vmem:[#allocation10 + $0x130] sm:$0xf] }
  0x3b   :  { %808 = vmatpush.bf16.msrb.mxu1 %v1400_v43  ;;  %344 = vmatmul.bf16.vlgmr.msra.gmra.mxu2 %v105_v42  ;;  %v1360_v30 = vor.u32 %v1662_v29, %v1359_v27  ;;  %v1680_v32 = vld [vmem:[#allocation10 + $0x134] sm:$0xf0]  ;;  %v1495_v33 = vld [vmem:[#allocation10 + $0x1b0] sm:$0xf]  ;;  %v1423_v43 = vld [vmem:[#allocation10 + $0x120] sm:$0xf] }
  0x3c   :  { %358 = vmatmul.bf16.vlgmr.msra.gmra.mxu3 %v105_v42  ;;  %822 = vmatpush.bf16.msrb.mxu2 %v1464_v49  ;;  %v1432_v34 = vor.u32 %v1680_v32, %v1431_v31  ;;  %v1696_v35 = vld [vmem:[#allocation10 + $0x1b4] sm:$0xf0]  ;;  %v1287_v37 = vld [vmem:[#allocation10 + $0x10] sm:$0xf]  ;;  %v1678_v44 = vld [vmem:[#allocation10 + $0x124] sm:$0xf0] }
  0x3d   :  { %836 = vmatpush.bf16.msrb.mxu3 %v1528_v52  ;;  %v1496_v36 = vor.u32 %v1696_v35, %v1495_v33  ;;  %v1644_v38 = vld [vmem:[#allocation10 + $0x14] sm:$0xf0]  ;;  %v1351_v39 = vld [vmem:[#allocation10 + $0x90] sm:$0xf]  ;;  %v1487_v45 = vld [vmem:[#allocation10 + $0x1a0] sm:$0xf]  ;;  %v1424_v46 = vor.u32 %v1678_v44, %v1423_v43 }
  0x3e   :  { %795 = vmatpush.bf16.msrb.mxu0 %v1328_v51  ;;  %v1288_v40 = vor.u32 %v1644_v38, %v1287_v37  ;;  %v1660_v41 = vld [vmem:[#allocation10 + $0x94] sm:$0xf0]  ;;  %v1694_v47 = vld [vmem:[#allocation10 + $0x1a4] sm:$0xf0]  ;;  %v1279_v49 = vld [vmem:[#allocation10] sm:$0xf] }
  0x3f   :  { %809 = vmatpush.bf16.msrb.mxu1 %v1392_v56  ;;  %v1352_v42 = vor.u32 %v1660_v41, %v1351_v39  ;;  %v1488_v48 = vor.u32 %v1694_v47, %v1487_v45  ;;  %v1642_v50 = vld [vmem:[#allocation10 + $0x4] sm:$0xf0]  ;;  %v1343_v51 = vld [vmem:[#allocation10 + $0x80] sm:$0xf]  ;;  %v1655_v54 = vld [vmem:[#allocation10 + $0x74] sm:$0xf] }
  0x40   :  { %823 = vmatpush.bf16.msrb.mxu2 %v1456_v61  ;;  %v1280_v52 = vor.u32 %v1642_v50, %v1279_v49  ;;  %v1658_v53 = vld [vmem:[#allocation10 + $0x84] sm:$0xf0]  ;;  %v1337_v55 = vld [vmem:[#allocation10 + $0x78] sm:$0xf0]  ;;  %v1671_v58 = vld [vmem:[#allocation10 + $0xf4] sm:$0xf] }
  0x41   :  { %837 = vmatpush.bf16.msrb.mxu3 %v1520_v63  ;;  %v1344_v56 = vor.u32 %v1658_v53, %v1343_v51  ;;  %v1340_v57 = vor.u32 %v1655_v54, %v1337_v55  ;;  %v1401_v59 = vld [vmem:[#allocation10 + $0xf8] sm:$0xf0]  ;;  %v1415_v60 = vld [vmem:[#allocation10 + $0x110] sm:$0xf]  ;;  %v1692_v0 = vld [vmem:[#allocation10 + $0x194] sm:$0xf0] }
  0x42   :  { %796 = vmatpush.bf16.msrb.mxu0 %v1320_v62  ;;  %v1404_v61 = vor.u32 %v1671_v58, %v1401_v59  ;;  %v1676_v62 = vld [vmem:[#allocation10 + $0x114] sm:$0xf0]  ;;  %v1479_v63 = vld [vmem:[#allocation10 + $0x190] sm:$0xf]  ;;  %v1329_v4 = vld [vmem:[#allocation10 + $0x68] sm:$0xf0] }
  0x43   :  { %810 = vmatpush.bf16.msrb.mxu1 %v1384_v3  ;;  %v1416_v1 = vor.u32 %v1676_v62, %v1415_v60  ;;  %v1480_v2 = vor.u32 %v1692_v0, %v1479_v63  ;;  %v1653_v3 = vld [vmem:[#allocation10 + $0x64] sm:$0xf]  ;;  %v1393_v7 = vld [vmem:[#allocation10 + $0xe8] sm:$0xf0]  ;;  %v1407_v8 = vld [vmem:[#allocation10 + $0x100] sm:$0xf] }
  0x44   :  { %824 = vmatpush.bf16.msrb.mxu2 %v1448_v9  ;;  %v1669_v5 = vld [vmem:[#allocation10 + $0xe4] sm:$0xf]  ;;  %v1332_v6 = vor.u32 %v1653_v3, %v1329_v4  ;;  %v1674_v9 = vld [vmem:[#allocation10 + $0x104] sm:$0xf0]  ;;  %v1471_v12 = vld [vmem:[#allocation10 + $0x180] sm:$0xf] }
  0x45   :  { %838 = vmatpush.bf16.msrb.mxu3 %v1512_v11  ;;  %v1408_v11 = vor.u32 %v1674_v9, %v1407_v8  ;;  %v1690_v13 = vld [vmem:[#allocation10 + $0x184] sm:$0xf0]  ;;  %v1687_v14 = vld [vmem:[#allocation10 + $0x174] sm:$0xf]  ;;  %v1465_v16 = vld [vmem:[#allocation10 + $0x178] sm:$0xf0] }
  0x46   :  { %797 = vmatpush.bf16.msrb.mxu0 %v1312_v10  ;;  %v1396_v10 = vor.u32 %v1669_v5, %v1393_v7  ;;  %v1703_v17 = vld [vmem:[#allocation10 + $0x1f4] sm:$0xf]  ;;  %v1529_v18 = vld [vmem:[#allocation10 + $0x1f8] sm:$0xf0]  ;;  %v1468_v19 = vor.u32 %v1687_v14, %v1465_v16  ;;  %v1685_v27 = vld [vmem:[#allocation10 + $0x164] sm:$0xf] }
  0x47   :  { %811 = vmatpush.bf16.msrb.mxu1 %v1376_v15  ;;  %v1472_v15 = vor.u32 %v1690_v13, %v1471_v12  ;;  %v1532_v20 = vor.u32 %v1703_v17, %v1529_v18  ;;  %v1385_v25 = vld [vmem:[#allocation10 + $0xd8] sm:$0xf0]  ;;  %v1701_v29 = vld [vmem:[#allocation10 + $0x1e4] sm:$0xf]  ;;  %v1521_v31 = vld [vmem:[#allocation10 + $0x1e8] sm:$0xf0] }
  0x48   :  { %825 = vmatpush.bf16.msrb.mxu2 %v1440_v21  ;;  %v1651_v21 = vld [vmem:[#allocation10 + $0x54] sm:$0xf]  ;;  %v1524_v32 = vor.u32 %v1701_v29, %v1521_v31  ;;  %v1649_v33 = vld [vmem:[#allocation10 + $0x44] sm:$0xf]  ;;  %v1377_v37 = vld [vmem:[#allocation10 + $0xc8] sm:$0xf0] }
  0x49   :  { %839 = vmatpush.bf16.msrb.mxu3 %v1504_v23  ;;  %v1667_v23 = vld [vmem:[#allocation10 + $0xd4] sm:$0xf]  ;;  %v1665_v35 = vld [vmem:[#allocation10 + $0xc4] sm:$0xf]  ;;  %v1513_v43 = vld [vmem:[#allocation10 + $0x1d8] sm:$0xf0] }
  0x4a   :  { %798 = vmatpush.bf16.msrb.mxu0 %v1304_v22  ;;  %v1321_v22 = vld [vmem:[#allocation10 + $0x58] sm:$0xf0]  ;;  %v1388_v26 = vor.u32 %v1667_v23, %v1385_v25  ;;  %v1380_v38 = vor.u32 %v1665_v35, %v1377_v37  ;;  %v1683_v39 = vld [vmem:[#allocation10 + $0x154] sm:$0xf]  ;;  %v1681_v51 = vld [vmem:[#allocation10 + $0x144] sm:$0xf] }
  0x4b   :  { %812 = vmatpush.bf16.msrb.mxu1 %v1368_v24  ;;  %v1324_v24 = vor.u32 %v1651_v21, %v1321_v22  ;;  %v1699_v41 = vld [vmem:[#allocation10 + $0x1d4] sm:$0xf]  ;;  %v1369_v50 = vld [vmem:[#allocation10 + $0xb8] sm:$0xf0]  ;;  %v1697_v55 = vld [vmem:[#allocation10 + $0x1c4] sm:$0xf] }
  0x4c   :  { %826 = vmatpush.bf16.msrb.mxu2 %v1432_v34  ;;  %v1313_v34 = vld [vmem:[#allocation10 + $0x48] sm:$0xf0]  ;;  %v1516_v44 = vor.u32 %v1699_v41, %v1513_v43  ;;  %v1647_v45 = vld [vmem:[#allocation10 + $0x34] sm:$0xf]  ;;  %v1661_v60 = vld [vmem:[#allocation10 + $0xa4] sm:$0xf] }
  0x4d   :  { %840 = vmatpush.bf16.msrb.mxu3 %v1496_v36  ;;  %v1316_v36 = vor.u32 %v1649_v33, %v1313_v34  ;;  %v1663_v47 = vld [vmem:[#allocation10 + $0xb4] sm:$0xf]  ;;  %v1297_v59 = vld [vmem:[#allocation10 + $0x28] sm:$0xf0]  ;;  %v1433_v3 = vld [vmem:[#allocation10 + $0x138] sm:$0xf0] }
  0x4e   :  { %799 = vmatpush.bf16.msrb.mxu0 %v1296_v28  ;;  %v1457_v28 = vld [vmem:[#allocation10 + $0x168] sm:$0xf0]  ;;  %v1372_v53 = vor.u32 %v1663_v47, %v1369_v50  ;;  %v1695_v4 = vld [vmem:[#allocation10 + $0x1b4] sm:$0xf]  ;;  %v1497_v7 = vld [vmem:[#allocation10 + $0x1b8] sm:$0xf0] }
  0x4f   :  { %813 = vmatpush.bf16.msrb.mxu1 %v1360_v30  ;;  %v1460_v30 = vor.u32 %v1685_v27, %v1457_v28  ;;  %v1289_v12 = vld [vmem:[#allocation10 + $0x18] sm:$0xf0]  ;;  %v1659_v13 = vld [vmem:[#allocation10 + $0x94] sm:$0xf]  ;;  %v1677_v17 = vld [vmem:[#allocation10 + $0x124] sm:$0xf] }
  0x50   :  { %827 = vmatpush.bf16.msrb.mxu2 %v1424_v46  ;;  %v1305_v46 = vld [vmem:[#allocation10 + $0x38] sm:$0xf0]  ;;  %v1425_v18 = vld [vmem:[#allocation10 + $0x128] sm:$0xf0]  ;;  %v1693_v23 = vld [vmem:[#allocation10 + $0x1a4] sm:$0xf] }
  0x51   :  { %841 = vmatpush.bf16.msrb.mxu3 %v1488_v48  ;;  %v1969_v48 = vld [vmem:[#allocation9] sm:$0xf]  ;;  %v1308_v49 = vor.u32 %v1647_v45, %v1305_v46  ;;  %v1428_v22 = vor.u32 %v1677_v17, %v1425_v18  ;;  %v1641_v28 = vld [vmem:[#allocation10 + $0x4] sm:$0xf]  ;;  %v1281_v29 = vld [vmem:[#allocation10 + $0x8] sm:$0xf0] }
  0x52   :  { %800 = vmatpush.bf16.msrb.mxu0 %v1288_v40  ;;  %v1449_v40 = vld [vmem:[#allocation10 + $0x158] sm:$0xf0]  ;;  %v140_v62 = vperm.slane %v1969_v48, 0  ;;  %v1657_v31 = vld [vmem:[#allocation10 + $0x84] sm:$0xf]  ;;  %v1713_v18 = vld [vmem:[#allocation12 + $0x30] sm:$0xff] }
  0x53   :  { %814 = vmatpush.bf16.msrb.mxu1 %v1352_v42  ;;  %v1452_v42 = vor.u32 %v1683_v39, %v1449_v40  ;;  %v1353_v16 = vld [vmem:[#allocation10 + $0x98] sm:$0xf0]  ;;  %v1675_v33 = vld [vmem:[#allocation10 + $0x114] sm:$0xf]  ;;  %v1673_v50 = vld [vmem:[#allocation10 + $0x104] sm:$0xf] }
  0x54   :  { %828 = vmatpush.bf16.msrb.mxu2 %v1416_v1  ;;  %v141_v1 = vperm.slane %v1969_v48, 1  ;;  %v1356_v21 = vor.u32 %v1659_v13, %v1353_v16  ;;  %v1691_v37 = vld [vmem:[#allocation10 + $0x194] sm:$0xf]  ;;  %v1714_v16 = vld [vmem:[#allocation12 + $0x38] sm:$0xff] }
  0x55   :  { %842 = vmatpush.bf16.msrb.mxu3 %v1480_v2  ;;  %v1679_v2 = vld [vmem:[#allocation10 + $0x134] sm:$0xf]  ;;  %v1722_v17 = vld [vmem:[#allocation12 + $0x78] sm:$0xff] }
  0x56   :  { %801 = vmatpush.bf16.msrb.mxu0 %v1280_v52  ;;  %v1441_v52 = vld [vmem:[#allocation10 + $0x148] sm:$0xf0] }
  0x57   :  { %815 = vmatpush.bf16.msrb.mxu1 %v1344_v56  ;;  %v1444_v54 = vor.u32 %v1681_v51, %v1441_v52  ;;  %v1505_v56 = vld [vmem:[#allocation10 + $0x1c8] sm:$0xf0] }
  0x58   :  { %829 = vmatpush.bf16.msrb.mxu2 %v1408_v11  ;;  %v1508_v58 = vor.u32 %v1697_v55, %v1505_v56  ;;  %v1643_v11 = vld [vmem:[#allocation10 + $0x14] sm:$0xf]  ;;  %v1409_v51 = vld [vmem:[#allocation10 + $0x108] sm:$0xf0]  ;;  %v1689_v55 = vld [vmem:[#allocation10 + $0x184] sm:$0xf] }
  0x59   :  { %843 = vmatpush.bf16.msrb.mxu3 %v1472_v15  ;;  %v1292_v15 = vor.u32 %v1643_v11, %v1289_v12  ;;  %v1473_v56 = vld [vmem:[#allocation10 + $0x188] sm:$0xf0] }
  0x5a   :  { %850 = vmatpush.bf16.msra.mxu0 %v1340_v57  ;;  %v1645_v57 = vld [vmem:[#allocation10 + $0x24] sm:$0xf] }
  0x5b   :  { %864 = vmatpush.bf16.msra.mxu1 %v1404_v61  ;;  %v1361_v61 = vld [vmem:[#allocation10 + $0xa8] sm:$0xf0]  ;;  %v1300_v63 = vor.u32 %v1645_v57, %v1297_v59 }
  0x5c   :  { %878 = vmatpush.bf16.msra.mxu2 %v1468_v19  ;;  %v1364_v0 = vor.u32 %v1661_v60, %v1361_v61 }
  0x5d   :  { %892 = vmatpush.bf16.msra.mxu3 %v1532_v20  ;;  %v142_v20 = vperm.slane %v1969_v48, 2 }
  0x5e   :  { %851 = vmatpush.bf16.msra.mxu0 %v1332_v6  ;;  %v1436_v6 = vor.u32 %v1679_v2, %v1433_v3 }
  0x5f   :  { %865 = vmatpush.bf16.msra.mxu1 %v1396_v10  ;;  %v1500_v10 = vor.u32 %v1695_v4, %v1497_v7 }
  0x60   :  { %879 = vmatpush.bf16.msra.mxu2 %v1460_v30  ;;  %v1284_v30 = vor.u32 %v1641_v28, %v1281_v29  ;;  %v1709_v29 = vld [vmem:[#allocation12 + $0x10] sm:$0xff] }
  0x61   :  { %893 = vmatpush.bf16.msra.mxu3 %v1524_v32  ;;  %v1345_v32 = vld [vmem:[#allocation10 + $0x88] sm:$0xf0] }
  0x62   :  { %852 = vmatpush.bf16.msra.mxu0 %v1324_v24  ;;  %v1489_v24 = vld [vmem:[#allocation10 + $0x1a8] sm:$0xf0]  ;;  %v1348_v35 = vor.u32 %v1657_v31, %v1345_v32  ;;  %v448_v31 = vld [vmem:[%s1991_s4] sm:$0x3] }
  0x63   :  { %866 = vmatpush.bf16.msra.mxu1 %v1388_v26  ;;  %v143_v26 = vperm.slane %v1969_v48, 3  ;;  %v1492_v27 = vor.u32 %v1693_v23, %v1489_v24  ;;  %v1711_v23 = vld [vmem:[#allocation12 + $0x20] sm:$0xff] }
  0x64   :  { %880 = vmatpush.bf16.msra.mxu2 %v1452_v42  ;;  %v1719_v24 = vld [vmem:[#allocation12 + $0x60] sm:$0xff] }
  0x65   :  { %894 = vmatpush.bf16.msra.mxu3 %v1516_v44 }
  0x66   :  { %853 = vmatpush.bf16.msra.mxu0 %v1316_v36  ;;  %v1417_v36 = vld [vmem:[#allocation10 + $0x118] sm:$0xf0] }
  0x67   :  { %867 = vmatpush.bf16.msra.mxu1 %v1380_v38  ;;  %v1481_v38 = vld [vmem:[#allocation10 + $0x198] sm:$0xf0]  ;;  %v1420_v40 = vor.u32 %v1675_v33, %v1417_v36 }
  0x68   :  { %881 = vmatpush.bf16.msra.mxu2 %v1444_v54  ;;  %v1484_v41 = vor.u32 %v1691_v37, %v1481_v38  ;;  %v1412_v54 = vor.u32 %v1673_v50, %v1409_v51  ;;  %v450_v37 = vperm.slane %v448_v31, 0  ;;  %v1707_v38 = vld [vmem:[#allocation12] sm:$0xff] }
  0x69   :  { %895 = vmatpush.bf16.msra.mxu3 %v1508_v58  ;;  %v1476_v58 = vor.u32 %v1689_v55, %v1473_v56 }
  0x6a   :  { %854 = vmatpush.bf16.msra.mxu0 %v1308_v49 }
  0x6b   :  { %868 = vmatpush.bf16.msra.mxu1 %v1372_v53 }
  0x6c   :  { %882 = vmatpush.bf16.msra.mxu2 %v1436_v6 }
  0x6d   :  { %896 = vmatpush.bf16.msra.mxu3 %v1500_v10 }
  0x6e   :  { %855 = vmatpush.bf16.msra.mxu0 %v1300_v63 }
  0x6f   :  { %869 = vmatpush.bf16.msra.mxu1 %v1364_v0 }
  0x70   :  { %883 = vmatpush.bf16.msra.mxu2 %v1428_v22 }
  0x71   :  { %897 = vmatpush.bf16.msra.mxu3 %v1492_v27  ;;  %v1718_v27 = vld [vmem:[#allocation12 + $0x58] sm:$0xff] }
  0x72   :  { %856 = vmatpush.bf16.msra.mxu0 %v1292_v15 }
  0x73   :  { %870 = vmatpush.bf16.msra.mxu1 %v1356_v21  ;;  %v1720_v21 = vld [vmem:[#allocation12 + $0x68] sm:$0xff] }
  0x74   :  { %884 = vmatpush.bf16.msra.mxu2 %v1420_v40 }
  0x75   :  { %898 = vmatpush.bf16.msra.mxu3 %v1484_v41 }
  0x76   :  { %857 = vmatpush.bf16.msra.mxu0 %v1284_v30  ;;  %v1717_v30 = vld [vmem:[#allocation12 + $0x50] sm:$0xff] }
  0x77   :  { %871 = vmatpush.bf16.msra.mxu1 %v1348_v35  ;;  %v1716_v35 = vld [vmem:[#allocation12 + $0x48] sm:$0xff] }
  0x78   :  { %885 = vmatpush.bf16.msra.mxu2 %v1412_v54 }
  0x79   :  { %899 = vmatpush.bf16.msra.mxu3 %v1476_v58 }
  0xb6   :  { %v317_v5 = vpop.f32.mrf.mxu0 }
  0xb7   :  { %v318_v8 = vadd.f32 %v317_v5, %v140_v62  ;;  %v331_v9 = vpop.f32.mrf.mxu1 }
  0xb8   :  { %v332_v14 = vadd.f32 %v331_v9, %v141_v1 }
  0xb9   :  { %v364_v19 = vmax.f32 %v318_v8, 0.0 }
  0xba   :  { %v365_v25 = vmax.f32 %v332_v14, 0.0 }
  0xbc   :  { %v372_v34 = vpack.c.bf16 %v365_v25, %v364_v19  ;;  %v1721_v19 = vld [vmem:[#allocation12 + $0x70] sm:$0xff] }
  0xbe   :  { %v345_v39 = vpop.f32.mrf.mxu2  ;;  %376 = vst [vmem:[#allocation2] sm:$0xff] %v372_v34  ;;  %v319_v44 = vpop.f32.mrf.mxu0  ;;  %v1708_v34 = vld [vmem:[#allocation12 + $0x8] sm:$0xff] }
  0xbf   :  { %v346_v42 = vadd.f32 %v345_v39, %v142_v20  ;;  %v359_v43 = vpop.f32.mrf.mxu3  ;;  %v320_v46 = vadd.f32 %v319_v44, %v140_v62  ;;  %v333_v47 = vpop.f32.mrf.mxu1  ;;  %v1715_v39 = vld [vmem:[#allocation12 + $0x40] sm:$0xff] }
  0xc0   :  { %v360_v45 = vadd.f32 %v359_v43, %v143_v26  ;;  %v334_v49 = vadd.f32 %v333_v47, %v141_v1 }
  0xc1   :  { %v366_v48 = vmax.f32 %v346_v42, 0.0  ;;  %v368_v53 = vmax.f32 %v320_v46, 0.0  ;;  %v451_v42 = vperm.slane %v448_v31, 1 }
  0xc2   :  { %v367_v52 = vmax.f32 %v360_v45, 0.0  ;;  %v369_v57 = vmax.f32 %v334_v49, 0.0 }
  0xc4   :  { %v373_v59 = vpack.c.bf16 %v367_v52, %v366_v48  ;;  %v374_v60 = vpack.c.bf16 %v369_v57, %v368_v53 }
  0xc5   :  { %v1263_v4 = vld [vmem:[#allocation2] sm:$0xf]  ;;  %v1637_v5 = vld [vmem:[#allocation2 + $0x4] sm:$0xf] }
  0xc6   :  { %377 = vst [vmem:[#allocation2 + $0x8] sm:$0xff] %v373_v59  ;;  %v347_v61 = vpop.f32.mrf.mxu2 }
  0xc7   :  { %378 = vst [vmem:[#allocation2 + $0x10] sm:$0xff] %v374_v60  ;;  %v348_v62 = vadd.f32 %v347_v61, %v142_v20  ;;  %v361_v63 = vpop.f32.mrf.mxu3  ;;  %v1712_v20 = vld [vmem:[#allocation12 + $0x28] sm:$0xff] }
  0xc8   :  { %v362_v0 = vadd.f32 %v361_v63, %v143_v26  ;;  %v1710_v26 = vld [vmem:[#allocation12 + $0x18] sm:$0xff] }
  0xc9   :  { %v370_v1 = vmax.f32 %v348_v62, 0.0 }
  0xca   :  { %v371_v2 = vmax.f32 %v362_v0, 0.0 }
  0xcc   :  { %v375_v3 = vpack.c.bf16 %v371_v2, %v370_v1 }
  0xcd   :  { %v1271_v10 = vld [vmem:[#allocation2 + $0x8] sm:$0xf]  ;;  %v1638_v12 = vld [vmem:[#allocation2 + $0xc] sm:$0xf] }
  0xce   :  { %379 = vst [vmem:[#allocation2 + $0x18] sm:$0xff] %v375_v3  ;;  %v1639_v6 = vld [vmem:[#allocation2 + $0xc] sm:$0xf0]  ;;  %v1265_v7 = vld [vmem:[#allocation2 + $0x10] sm:$0xf0] }
  0xcf   :  { %v1264_v8 = vor.u32 %v1639_v6, %v1263_v4  ;;  %v1268_v9 = vor.u32 %v1637_v5, %v1265_v7 }
  0xd1   :  { %802 = vmatmul.bf16.vlgmr.msrb.gmra.mxu0 %v1264_v8  ;;  %816 = vmatmul.bf16.vlgmr.msrb.gmra.mxu1 %v1268_v9 }
  0xd2   :  { %1058 = vmatpush.bf16.msrb.mxu0 %v1714_v16  ;;  %1072 = vmatpush.bf16.msrb.mxu1 %v1722_v17 }
  0xd5   :  { %v1640_v11 = vld [vmem:[#allocation2 + $0x14] sm:$0xf0]  ;;  %v1273_v13 = vld [vmem:[#allocation2 + $0x18] sm:$0xf0] }
  0xd6   :  { %v1272_v14 = vor.u32 %v1640_v11, %v1271_v10  ;;  %v1276_v15 = vor.u32 %v1638_v12, %v1273_v13  ;;  %1059 = vmatpush.bf16.msrb.mxu0 %v1713_v18  ;;  %1073 = vmatpush.bf16.msrb.mxu1 %v1721_v19 }
  0xd8   :  { %830 = vmatmul.bf16.vlgmr.msrb.gmra.mxu2 %v1272_v14  ;;  %844 = vmatmul.bf16.vlgmr.msrb.gmra.mxu3 %v1276_v15 }
  0xda   :  { %1060 = vmatpush.bf16.msrb.mxu0 %v1712_v20  ;;  %1074 = vmatpush.bf16.msrb.mxu1 %v1720_v21 }
  0xde   :  { %1061 = vmatpush.bf16.msrb.mxu0 %v1711_v23  ;;  %1075 = vmatpush.bf16.msrb.mxu1 %v1719_v24 }
  0xe1   :  { %858 = vmatmul.bf16.vlgmr.msra.gmra.mxu0 %v1264_v8  ;;  %872 = vmatmul.bf16.vlgmr.msra.gmra.mxu1 %v1268_v9 }
  0xe2   :  { %1062 = vmatpush.bf16.msrb.mxu0 %v1710_v26  ;;  %1076 = vmatpush.bf16.msrb.mxu1 %v1718_v27 }
  0xe6   :  { %1063 = vmatpush.bf16.msrb.mxu0 %v1709_v29  ;;  %1077 = vmatpush.bf16.msrb.mxu1 %v1717_v30 }
  0xe8   :  { %886 = vmatmul.bf16.vlgmr.msra.gmra.mxu2 %v1272_v14  ;;  %900 = vmatmul.bf16.vlgmr.msra.gmra.mxu3 %v1276_v15  ;;  %v1735_v15 = vld [vmem:[%s1993_s6] ss:$0 sm:$0xff]  ;;  %s1907_s6 = smov [#allocation13]  }
  0xe9   :  { %s1116_s30 = sshll.u32 %s1907_s6, 4  ;;  %s1117_s30 = int_to_ptr.vmem [resolvable:$true] %s1116_s30 }
  0xea   :  { %1064 = vmatpush.bf16.msrb.mxu0 %v1708_v34  ;;  %1078 = vmatpush.bf16.msrb.mxu1 %v1716_v35 }
  0xee   :  { %1065 = vmatpush.bf16.msrb.mxu0 %v1707_v38  ;;  %1079 = vmatpush.bf16.msrb.mxu1 %v1715_v39 }
 0x14e   :  { %v803_v22 = vpop.f32.mrf.mxu0  ;;  %v817_v25 = vpop.f32.mrf.mxu1 }
 0x14f   :  { %v804_v41 = vadd.f32 %v803_v22, %v450_v37 }
 0x151   :  { %v818_v45 = vadd.f32 %v817_v25, %v804_v41 }
 0x156   :  { %v805_v28 = vpop.f32.mrf.mxu0  ;;  %v819_v36 = vpop.f32.mrf.mxu1 }
 0x157   :  { %v806_v49 = vadd.f32 %v805_v28, %v450_v37 }
 0x159   :  { %v820_v56 = vadd.f32 %v819_v36, %v806_v49 }
 0x15b   :  { %v831_v32 = vpop.f32.mrf.mxu2  ;;  %v845_v33 = vpop.f32.mrf.mxu3 }
 0x15c   :  { %v832_v48 = vadd.f32 %v831_v32, %v818_v45 }
 0x15e   :  { %v859_v40 = vpop.f32.mrf.mxu0  ;;  %v873_v47 = vpop.f32.mrf.mxu1  ;;  %v846_v54 = vadd.f32 %v845_v33, %v832_v48 }
 0x15f   :  { %v860_v46 = vadd.f32 %v859_v40, %v451_v42 }
 0x160   :  { %v906_v59 = vmax.f32 %v846_v54, 0.0 }
 0x161   :  { %v874_v50 = vadd.f32 %v873_v47, %v860_v46 }
 0x163   :  { %v833_v43 = vpop.f32.mrf.mxu2  ;;  %v847_v44 = vpop.f32.mrf.mxu3 }
 0x164   :  { %v834_v60 = vadd.f32 %v833_v43, %v820_v56 }
 0x166   :  { %v861_v51 = vpop.f32.mrf.mxu0  ;;  %v875_v62 = vpop.f32.mrf.mxu1  ;;  %v848_v2 = vadd.f32 %v847_v44, %v834_v60 }
 0x167   :  { %v862_v57 = vadd.f32 %v861_v51, %v451_v42 }
 0x168   :  { %v908_v6 = vmax.f32 %v848_v2, 0.0 }
 0x169   :  { %v876_v63 = vadd.f32 %v875_v62, %v862_v57 }
 0x16b   :  { %v887_v52 = vpop.f32.mrf.mxu2  ;;  %v901_v53 = vpop.f32.mrf.mxu3 }
 0x16c   :  { %v888_v55 = vadd.f32 %v887_v52, %v874_v50 }
 0x16e   :  { %v902_v58 = vadd.f32 %v901_v53, %v888_v55 }
 0x170   :  { %v907_v61 = vmax.f32 %v902_v58, 0.0 }
 0x172   :  { %v910_v0 = vpack.c.bf16 %v907_v61, %v906_v59 }
 0x173   :  { %v889_v1 = vpop.f32.mrf.mxu2  ;;  %v903_v4 = vpop.f32.mrf.mxu3 }
 0x174   :  { %912 = vst [vmem:[#allocation3] sm:$0xff] %v910_v0  ;;  %v890_v3 = vadd.f32 %v889_v1, %v876_v63 }
 0x176   :  { %v904_v5 = vadd.f32 %v903_v4, %v890_v3 }
 0x178   :  { %v909_v7 = vmax.f32 %v904_v5, 0.0 }
 0x17a   :  { %v911_v8 = vpack.c.bf16 %v909_v7, %v908_v6 }
 0x17b   :  { %v1535_v9 = vld [vmem:[#allocation3] sm:$0xf]  ;;  %v1705_v11 = vld [vmem:[#allocation3 + $0x4] sm:$0xf] }
 0x17c   :  { %913 = vst [vmem:[#allocation3 + $0x8] sm:$0xff] %v911_v8 }
 0x183   :  { %v1706_v10 = vld [vmem:[#allocation3 + $0x4] sm:$0xf0]  ;;  %v1537_v12 = vld [vmem:[#allocation3 + $0x8] sm:$0xf0] }
 0x184   :  { %v1536_v13 = vor.u32 %v1706_v10, %v1535_v9  ;;  %v1540_v14 = vor.u32 %v1705_v11, %v1537_v12 }
 0x186   :  { %1066 = vmatmul.bf16.vlgmr.msrb.gmra.mxu0 %v1536_v13  ;;  %1080 = vmatmul.bf16.vlgmr.msrb.gmra.mxu1 %v1540_v14 }
 0x203   :  { %v1067_v16 = vpop.f32.mrf.mxu0  ;;  %v1081_v17 = vpop.f32.mrf.mxu1 }
 0x204   :  { %v1068_v18 = vadd.f32 %v1735_v15, %v1067_v16 }
 0x206   :  { %v1082_v19 = vadd.f32 %v1081_v17, %v1068_v18 }
 0x208   :  { %1086 = vmax.xlane.f32.xlu0 %v1082_v19 }
 0x20b   :  { %v1069_v20 = vpop.f32.mrf.mxu0  ;;  %v1083_v22 = vpop.f32.mrf.mxu1 }
 0x20c   :  { %v1070_v21 = vadd.f32 %v1735_v15, %v1069_v20 }
 0x20e   :  { %v1084_v23 = vadd.f32 %v1083_v22, %v1070_v21 }
 0x210   :  { %1088 = vmax.xlane.f32.xlu0 %v1084_v23 }
 0x27b   :  { %v1087_v24 = vpop.xlane.xlu0 %1086 }
 0x27c   :  { %v1090_v25 = vsub.f32 %v1082_v19, %v1087_v24 }
 0x27e   :  { %v1092_v26 = vmul.f32 1.442695, %v1090_v25 }
 0x280   :  { %1736 = vpow2.f32 %v1092_v26 }
 0x283   :  { %v1089_v27 = vpop.xlane.xlu0 %1088 }
 0x284   :  { %v1091_v28 = vsub.f32 %v1084_v23, %v1089_v27 }
 0x286   :  { %v1737_v29 = vpop.eup %1736  ;;  %v1094_v30 = vmul.f32 1.442695, %v1091_v28 }
 0x287   :  { %1096 = vadd.xlane.f32.xlu1 %v1737_v29 }
 0x288   :  { %1738 = vpow2.f32 %v1094_v30 }
 0x28e   :  { %v1739_v31 = vpop.eup %1738 }
 0x28f   :  { %1098 = vadd.xlane.f32.xlu1 %v1739_v31 }
 0x2fa   :  { %v1097_v32 = vpop.xlane.xlu1 %1096 }
 0x2fb   :  { %1740 = vrcp.f32 %v1097_v32 }
 0x301   :  { %v1741_v33 = vpop.eup %1740 }
 0x302   :  { %v1102_v34 = vmul.f32 %v1741_v33, %v1097_v32  ;;  %v1099_v35 = vpop.xlane.xlu1 %1098 }
 0x303   :  { %1742 = vrcp.f32 %v1099_v35 }
 0x304   :  { %v1104_v36 = vsub.f32 2.0, %v1102_v34 }
 0x306   :  { %v1106_v37 = vmul.f32 %v1741_v33, %v1104_v36 }
 0x308   :  { %v1108_v38 = vmul.f32 %v1737_v29, %v1106_v37 }
 0x309   :  { %v1743_v39 = vpop.eup %1742 }
 0x30a   :  { %1110 = vst [vmem:[#allocation13] sm:$0xff] %v1108_v38  ;;  %v1103_v40 = vmul.f32 %v1743_v39, %v1099_v35 }
 0x30c   :  { %v1105_v41 = vsub.f32 2.0, %v1103_v40 }
 0x30e   :  { %v1107_v42 = vmul.f32 %v1743_v39, %v1105_v41 }
 0x310   :  { %v1109_v43 = vmul.f32 %v1739_v31, %v1107_v42 }
 0x312   :  { %1111 = vst [vmem:[#allocation13 + $0x8] sm:$0xff] %v1109_v43 }
 0x313   :  { %1124 = dma.vmem_to_hbm [thread:$0]  %s1117_s30, 256, %s1119_s10, [#allocation6], %s1900_s1, %s1900_s1, %s1901_s16  }
 0x314   :  { %1894 = dma.done.wait [#allocation6], 256  }
 0x315   :  { %1895 = vsyncadd [#allocation6], 4294967040 }
 0x316   :  { %1129 = vsyncpa [#allocation5], 1 }
 0x317   :  { %1130 = vsyncpa [#allocation8], 1 }
 0x318   :  { %1131 = vsyncpa [#allocation11], 1 }
 0x319   :  { %1132 = vsyncpa [#allocation6], 1 }

</bundles_post_ra>
